<compile_context>
chip_gen: v7x
topology: tpu7x:2x2x1
jax: 0.10.0
libtpu: 0.0.40
codegen_flags: <defaults>
</compile_context>

<pallas_src>
import functools
from typing import NamedTuple

import jax
import jax.numpy as jnp
from jax.experimental import pallas as pl
from jax.experimental.pallas import tpu as pltpu

LANE = 128
SUBLANE_BF16 = 16          # bf16 sublane packing -> batch-tile granularity
BATCH_TILE_MAX = 256       # full 256x256 MXU rows on v6e / v7x
DEFAULT_VMEM = 64 << 20    # conservative (v7x per-core) if get_tpu_info fails


def _round_up(x, m):
    return ((x + m - 1) // m) * m


def _vmem_capacity_bytes():
    try:
        return int(pltpu.get_tpu_info().vmem_capacity_bytes)
    except Exception:
        return DEFAULT_VMEM


class Meta(NamedTuple):
    L: int        # latent_dim
    F: int        # image_size * image_size
    LP: int       # padded latent_dim
    FP: int       # padded F
    TN: int       # W2 / output column tile
    TK: int       # K tile for the split (K-streamed) path
    split_k: bool # use the two-stage path (bounds VMEM for huge F)


# ----------------------------------------------------------------------------
# Kernels
# ----------------------------------------------------------------------------
def _fused_kernel(x_ref, w1_ref, b1_ref, w2_ref, b2_ref, o_ref, h_ref):
    # Grid: (batch tile i, output-column tile j).
    # NOTE: j MUST stay the innermost, sequential ("arbitrary") axis — the
    # hidden activations are computed once at j == 0 into the h_ref scratch
    # and reused for every subsequent column tile of the same batch tile.
    #   x_ref : (TB, FP) bf16  resident across j
    #   w1_ref: (FP, LP) bf16  K-major W1^T, grid-invariant (single-buffered)
    #   b1_ref: (1, LP)  f32   grid-invariant
    #   w2_ref: (LP, TN) bf16  column tile of W2^T
    #   b2_ref: (1, TN)  f32
    #   o_ref : (TB, TN) bf16
    #   h_ref : (TB, LP) bf16  scratch: relu(x @ W1^T + b1)
    @pl.when(pl.program_id(1) == 0)
    def _():
        h = jnp.dot(x_ref[...], w1_ref[...], preferred_element_type=jnp.float32)
        h = jnp.maximum(h + b1_ref[...], 0.0)
        h_ref[...] = h.astype(h_ref.dtype)

    y = jnp.dot(h_ref[...], w2_ref[...], preferred_element_type=jnp.float32)
    o_ref[...] = jax.nn.sigmoid(y + b2_ref[...]).astype(o_ref.dtype)


def _hidden_kernel(x_ref, w1_ref, b1_ref, h_ref, acc_ref):
    # Stage 1 of the split path: h = relu(x @ W1^T + b1), K streamed.
    # Grid: (batch tile i, K tile k), k innermost ("arbitrary") reduction.
    @pl.when(pl.program_id(1) == 0)
    def _():
        acc_ref[...] = jnp.zeros_like(acc_ref)

    acc_ref[...] += jnp.dot(x_ref[...], w1_ref[...],
                            preferred_element_type=jnp.float32)

    @pl.when(pl.program_id(1) == pl.num_programs(1) - 1)
    def _():
        h = jnp.maximum(acc_ref[...] + b1_ref[...], 0.0)
        h_ref[...] = h.astype(h_ref.dtype)


def _decode_kernel(h_ref, w2_ref, b2_ref, o_ref):
    # Stage 2 of the split path: out = sigmoid(h @ W2^T + b2), columns streamed.
    y = jnp.dot(h_ref[...], w2_ref[...], preferred_element_type=jnp.float32)
    o_ref[...] = jax.nn.sigmoid(y + b2_ref[...]).astype(o_ref.dtype)


# ----------------------------------------------------------------------------
# Parameter prep (one-time: pad, cast, transpose, pick tiling)
# ----------------------------------------------------------------------------
def prepare_params(w1, b1, w2, b2):
    """w1: (L, F), b1: (L,), w2: (F, L), b2: (F,)  (PyTorch nn.Linear layout)."""
    L, F = w1.shape
    LP = _round_up(L, LANE)
    FP = _round_up(F, LANE)

    cap = _vmem_capacity_bytes()
    # Bigger column tiles on v7x (<=64 MiB VMEM but 3.2 TB/s HBM) to amortize
    # per-grid-step overhead; 2048 elsewhere.
    col_tile = 4096 if cap <= (64 << 20) else 2048
    if FP > 2 * col_tile:
        TN = col_tile
        FP = _round_up(FP, TN)
    else:
        TN = FP

    # Decide whether the fused-resident footprint (double-buffered x tile +
    # single-buffered W1^T + streamed W2 tiles) fits the VMEM budget; if not,
    # K-stream the first matmul via the two-stage path.
    tb = BATCH_TILE_MAX
    resident = 2 * tb * FP * 2 + FP * LP * 2 + tb * LP * 2
    streamed = 2 * (LP * TN * 2 + TN * 4 + tb * TN * 2)
    split_k = (resident + streamed) > int(0.75 * cap)
    TK = min(2048, FP) if split_k else FP

    # One-time pad + cast + transpose (kernels consume plain (M,K)x(K,N) dots).
    w1t = jnp.pad(w1.astype(jnp.bfloat16), ((0, LP - L), (0, FP - F))).T  # (FP, LP)
    w2t = jnp.pad(w2.astype(jnp.bfloat16), ((0, FP - F), (0, LP - L))).T  # (LP, FP)
    b1p = jnp.pad(b1.astype(jnp.float32), (0, LP - L)).reshape(1, LP)
    b2p = jnp.pad(b2.astype(jnp.float32), (0, FP - F)).reshape(1, FP)

    params = dict(w1t=w1t, b1=b1p, w2t=w2t, b2=b2p)
    meta = Meta(L=L, F=F, LP=LP, FP=FP, TN=TN, TK=TK, split_k=split_k)
    return params, meta


# ----------------------------------------------------------------------------
# Forward
# ----------------------------------------------------------------------------
def _weight_spec(block_shape, index_map, single_buffer):
    if single_buffer:
        # Grid-invariant operand: one VMEM buffer is enough.
        return pl.BlockSpec(block_shape, index_map, pipeline_mode=pl.Buffered(1))
    return pl.BlockSpec(block_shape, index_map)


@functools.partial(
    jax.jit,
    static_argnames=("meta", "tb", "single_buffer_weights", "force_split"))
def _forward_impl(x_nchw, w1t, b1, w2t, b2, *, meta, tb,
                  single_buffer_weights, force_split):
    B, _, H, W = x_nchw.shape
    F, FP, LP, TN, TK = meta.F, meta.FP, meta.LP, meta.TN, meta.TK
    BP = _round_up(B, tb)

    # flatten + bf16 cast + pad: fuses into one HBM pass under this jit.
    x = jnp.pad(x_nchw.reshape(B, -1).astype(jnp.bfloat16),
                ((0, BP - B), (0, FP - F)))

    vmem_limit = max(32 << 20, int(0.85 * _vmem_capacity_bytes()))
    grid = (BP // tb, FP // TN)
    use_split = force_split or meta.split_k

    if not use_split:
        out_pad = pl.pallas_call(
            _fused_kernel,
            out_shape=jax.ShapeDtypeStruct((BP, FP), jnp.bfloat16),
            grid=grid,
            in_specs=[
                pl.BlockSpec((tb, FP), lambda i, j: (i, 0)),            # x
                _weight_spec((FP, LP), lambda i, j: (0, 0),
                             single_buffer_weights),                    # W1^T
                _weight_spec((1, LP), lambda i, j: (0, 0),
                             single_buffer_weights),                    # b1
                pl.BlockSpec((LP, TN), lambda i, j: (0, j)),            # W2^T tile
                pl.BlockSpec((1, TN), lambda i, j: (0, j)),             # b2 tile
            ],
            out_specs=pl.BlockSpec((tb, TN), lambda i, j: (i, j)),
            scratch_shapes=[pltpu.VMEM((tb, LP), jnp.bfloat16)],
            compiler_params=pltpu.CompilerParams(
                dimension_semantics=("parallel", "arbitrary"),
                vmem_limit_bytes=vmem_limit,
            ),
        )(x, w1t, b1, w2t, b2)
    else:
        # Stage 1: K-streamed hidden (bounds resident VMEM for huge F / v7x).
        h = pl.pallas_call(
            _hidden_kernel,
            out_shape=jax.ShapeDtypeStruct((BP, LP), jnp.bfloat16),
            grid=(BP // tb, FP // TK),
            in_specs=[
                pl.BlockSpec((tb, TK), lambda i, k: (i, k)),            # x chunk
                pl.BlockSpec((TK, LP), lambda i, k: (k, 0)),            # W1^T chunk
                _weight_spec((1, LP), lambda i, k: (0, 0),
                             single_buffer_weights),                    # b1
            ],
            out_specs=pl.BlockSpec((tb, LP), lambda i, k: (i, 0)),
            scratch_shapes=[pltpu.VMEM((tb, LP), jnp.float32)],
            compiler_params=pltpu.CompilerParams(
                dimension_semantics=("parallel", "arbitrary"),
                vmem_limit_bytes=vmem_limit,
            ),
        )(x, w1t, b1)
        # Stage 2: column-streamed decode.
        out_pad = pl.pallas_call(
            _decode_kernel,
            out_shape=jax.ShapeDtypeStruct((BP, FP), jnp.bfloat16),
            grid=grid,
            in_specs=[
                pl.BlockSpec((tb, LP), lambda i, j: (i, 0)),            # h
                pl.BlockSpec((LP, TN), lambda i, j: (0, j)),            # W2^T tile
                pl.BlockSpec((1, TN), lambda i, j: (0, j)),             # b2 tile
            ],
            out_specs=pl.BlockSpec((tb, TN), lambda i, j: (i, j)),
            compiler_params=pltpu.CompilerParams(
                dimension_semantics=("parallel", "parallel"),
                vmem_limit_bytes=vmem_limit,
            ),
        )(h, w2t, b2)

    # Slice off padding, cast back to f32, unflatten — fuses into one pass.
    return out_pad[:B, :F].astype(jnp.float32).reshape(B, 1, H, W)


def image_encoder_forward(x_nchw, params, meta, *,
                          single_buffer_weights=True, force_split=False):
    """x_nchw: (B, 1, H, W) float32 -> (B, 1, H, W) float32."""
    B, C, H, W = x_nchw.shape
    assert C * H * W == meta.F, "input spatial size does not match params"
    # Tight batch tile for small batches (16 = bf16 sublane packing),
    # 256 rows for large batches (full 256x256 MXU on v6e/v7x).
    tb = min(BATCH_TILE_MAX, _round_up(B, SUBLANE_BF16))
    return _forward_impl(
        x_nchw, params["w1t"], params["b1"], params["w2t"], params["b2"],
        meta=meta, tb=tb, single_buffer_weights=single_buffer_weights,
        force_split=force_split)


def init_params(image_size, latent_dim, key):
    """Deterministic init matching nn.Linear (uniform +-1/sqrt(fan_in))."""
    F = image_size * image_size
    k1, k2, k3, k4 = jax.random.split(key, 4)
    bound1 = 1.0 / jnp.sqrt(F)
    bound2 = 1.0 / jnp.sqrt(latent_dim)
    w1 = jax.random.uniform(k1, (latent_dim, F), jnp.float32, -bound1, bound1)
    b1 = jax.random.uniform(k2, (latent_dim,), jnp.float32, -bound1, bound1)
    w2 = jax.random.uniform(k3, (F, latent_dim), jnp.float32, -bound2, bound2)
    b2 = jax.random.uniform(k4, (F,), jnp.float32, -bound2, bound2)
    return w1, b1, w2, b2


if __name__ == "__main__":
    image_size = 16
    latent_dim = 32
    batch = 2

    key = jax.random.PRNGKey(0)
    kx, kp = jax.random.split(key)
    x = jax.random.normal(kx, (batch, 1, image_size, image_size), jnp.float32)
    w1, b1, w2, b2 = init_params(image_size, latent_dim, kp)
    params, meta = prepare_params(w1, b1, w2, b2)

    def run(**kw):
        return jax.block_until_ready(image_encoder_forward(x, params, meta, **kw))

    try:
        out = run()
    except Exception:
        # pl.Buffered(1) (single-buffered resident weights) may be rejected by
        # some JAX versions; fall back to default double buffering.
        out = run(single_buffer_weights=False)

    # Reference (pure f32). bf16 matmul operands + bf16 output store bound the
    # error to ~1e-2; sigmoid compresses it further.
    ref = jax.nn.sigmoid(
        jnp.maximum(x.reshape(batch, -1) @ w1.T + b1, 0.0) @ w2.T + b2
    ).reshape(batch, 1, image_size, image_size)
    assert out.shape == ref.shape
    max_err = float(jnp.max(jnp.abs(out - ref)))
    assert max_err < 2e-2, f"fused path max abs err {max_err}"

    # Also exercise the K-streamed two-stage path (used for very large images
    # on v7x) to keep it validated at small shapes.
    try:
        out_split = run(force_split=True)
    except Exception:
        out_split = run(force_split=True, single_buffer_weights=False)
    max_err_split = float(jnp.max(jnp.abs(out_split - ref)))
    assert max_err_split < 2e-2, f"split path max abs err {max_err_split}"

    print("KERNEL_OK")
</pallas_src>

<mosaic_0001>
module attributes {stable_mosaic.version = 11 : i64} {
  func.func @_fused_kernel(%arg0: i32, %arg1: i32, %arg2: memref<16x256xbf16, #tpu.memory_space<vmem>>, %arg3: memref<256x128xbf16, #tpu.memory_space<vmem>>, %arg4: memref<1x128xf32, #tpu.memory_space<vmem>>, %arg5: memref<128x256xbf16, #tpu.memory_space<vmem>>, %arg6: memref<1x256xf32, #tpu.memory_space<vmem>>, %arg7: memref<16x256xbf16, #tpu.memory_space<vmem>>, %arg8: memref<16x128xbf16, #tpu.memory_space<vmem>>) attributes {dimension_semantics = [#tpu.dimension_semantics<parallel>, #tpu.dimension_semantics<arbitrary>], iteration_bounds = array<i64: 1, 1>, scalar_prefetch = 0 : i64, scratch_operands = 1 : i64, tpu.core_type = #tpu.core_type<tc>, window_params = [{transform_indices = @transform_0, window_bounds = array<i64: 16, 256>}, {pipeline_mode = #tpu.pipeline_mode<synchronous>, transform_indices = @transform_1, window_bounds = array<i64: 256, 128>}, {pipeline_mode = #tpu.pipeline_mode<synchronous>, transform_indices = @transform_2, window_bounds = array<i64: 1, 128>}, {transform_indices = @transform_3, window_bounds = array<i64: 128, 256>}, {transform_indices = @transform_4, window_bounds = array<i64: 1, 256>}, {transform_indices = @transform_5, window_bounds = array<i64: 16, 256>}]} {
    %c0_i32 = arith.constant 0 : i32
    %0 = arith.cmpi eq, %arg1, %c0_i32 : i32
    %1 = arith.extui %0 : i1 to i32
    %c0_i32_0 = arith.constant 0 : i32
    %2 = arith.cmpi ne, %1, %c0_i32_0 : i32
    scf.if %2 {
      %c0_9 = arith.constant 0 : index
      %c0_10 = arith.constant 0 : index
      %16 = vector.load %arg2[%c0_9, %c0_10] : memref<16x256xbf16, #tpu.memory_space<vmem>>, vector<16x256xbf16>
      %c0_11 = arith.constant 0 : index
      %c0_12 = arith.constant 0 : index
      %17 = vector.load %arg3[%c0_11, %c0_12] : memref<256x128xbf16, #tpu.memory_space<vmem>>, vector<256x128xbf16>
      %cst_13 = arith.constant dense<0.000000e+00> : vector<16x128xf32>
      %18 = tpu.matmul %16, %17, %cst_13 {dimension_numbers = #tpu.dot_dimension_numbers<[1], [0], [0], [1], [0, 0, 1, 1], [], []>} : vector<16x256xbf16>, vector<256x128xbf16>, vector<16x128xf32> -> vector<16x128xf32>
      %c0_14 = arith.constant 0 : index
      %c0_15 = arith.constant 0 : index
      %19 = vector.load %arg4[%c0_14, %c0_15] : memref<1x128xf32, #tpu.memory_space<vmem>>, vector<1x128xf32>
      %20 = vector.broadcast %19 : vector<1x128xf32> to vector<16x128xf32>
      %21 = arith.addf %18, %20 : vector<16x128xf32>
      %cst_16 = arith.constant 0.000000e+00 : f32
      %22 = vector.broadcast %cst_16 : f32 to vector<16x128xf32>
      %23 = arith.maximumf %21, %22 : vector<16x128xf32>
      %24 = arith.truncf %23 : vector<16x128xf32> to vector<16x128xbf16>
      %c0_17 = arith.constant 0 : index
      %c0_18 = arith.constant 0 : index
      %25 = vector.load %arg8[%c0_17, %c0_18] : memref<16x128xbf16, #tpu.memory_space<vmem>>, vector<16x128xbf16>
      tpu.vector_store %arg8[%c0_17, %c0_18], %24 {strides = array<i32>} : memref<16x128xbf16, #tpu.memory_space<vmem>>, vector<16x128xbf16>,
    } else {
    }
    %c0 = arith.constant 0 : index
    %c0_1 = arith.constant 0 : index
    %3 = vector.load %arg8[%c0, %c0_1] : memref<16x128xbf16, #tpu.memory_space<vmem>>, vector<16x128xbf16>
    %c0_2 = arith.constant 0 : index
    %c0_3 = arith.constant 0 : index
    %4 = vector.load %arg5[%c0_2, %c0_3] : memref<128x256xbf16, #tpu.memory_space<vmem>>, vector<128x256xbf16>
    %cst = arith.constant dense<0.000000e+00> : vector<16x256xf32>
    %5 = tpu.matmul %3, %4, %cst {dimension_numbers = #tpu.dot_dimension_numbers<[1], [0], [0], [1], [0, 0, 1, 1], [], []>} : vector<16x128xbf16>, vector<128x256xbf16>, vector<16x256xf32> -> vector<16x256xf32>
    %c0_4 = arith.constant 0 : index
    %c0_5 = arith.constant 0 : index
    %6 = vector.load %arg6[%c0_4, %c0_5] : memref<1x256xf32, #tpu.memory_space<vmem>>, vector<1x256xf32>
    %7 = vector.broadcast %6 : vector<1x256xf32> to vector<16x256xf32>
    %8 = arith.addf %5, %7 : vector<16x256xf32>
    %9 = arith.negf %8 : vector<16x256xf32>
    %10 = math.exp %9 : vector<16x256xf32>
    %cst_6 = arith.constant 1.000000e+00 : f32
    %11 = vector.broadcast %cst_6 : f32 to vector<16x256xf32>
    %12 = arith.addf %11, %10 : vector<16x256xf32>
    %13 = arith.divf %11, %12 : vector<16x256xf32>
    %14 = arith.truncf %13 : vector<16x256xf32> to vector<16x256xbf16>
    %c0_7 = arith.constant 0 : index
    %c0_8 = arith.constant 0 : index
    %15 = vector.load %arg7[%c0_7, %c0_8] : memref<16x256xbf16, #tpu.memory_space<vmem>>, vector<16x256xbf16>
    tpu.vector_store %arg7[%c0_7, %c0_8], %14 {strides = array<i32>} : memref<16x256xbf16, #tpu.memory_space<vmem>>, vector<16x256xbf16>,
    return
  }
  func.func @transform_0(%arg0: i32, %arg1: i32) -> (i32, i32) {
    %c0_i32 = arith.constant 0 : i32
    %c0_i32_0 = arith.constant 0 : i32
    return %arg0, %c0_i32 : i32, i32
  }
  func.func @transform_1(%arg0: i32, %arg1: i32) -> (i32, i32) {
    %c0_i32 = arith.constant 0 : i32
    %c0_i32_0 = arith.constant 0 : i32
    %c0_i32_1 = arith.constant 0 : i32
    return %c0_i32, %c0_i32_0 : i32, i32
  }
  func.func @transform_2(%arg0: i32, %arg1: i32) -> (i32, i32) {
    %c0_i32 = arith.constant 0 : i32
    %c0_i32_0 = arith.constant 0 : i32
    %c0_i32_1 = arith.constant 0 : i32
    return %c0_i32, %c0_i32_0 : i32, i32
  }
  func.func @transform_3(%arg0: i32, %arg1: i32) -> (i32, i32) {
    %c0_i32 = arith.constant 0 : i32
    %c0_i32_0 = arith.constant 0 : i32
    return %c0_i32, %arg1 : i32, i32
  }
  func.func @transform_4(%arg0: i32, %arg1: i32) -> (i32, i32) {
    %c0_i32 = arith.constant 0 : i32
    %c0_i32_0 = arith.constant 0 : i32
    return %c0_i32, %arg1 : i32, i32
  }
  func.func @transform_5(%arg0: i32, %arg1: i32) -> (i32, i32) {
    %c0_i32 = arith.constant 0 : i32
    return %arg0, %arg1 : i32, i32
  }
}

module attributes {stable_mosaic.version = 11 : i64} {
  func.func @_fused_kernel(%arg0: i32, %arg1: i32, %arg2: memref<16x256xbf16, #tpu.memory_space<vmem>>, %arg3: memref<256x128xbf16, #tpu.memory_space<vmem>>, %arg4: memref<1x128xf32, #tpu.memory_space<vmem>>, %arg5: memref<128x256xbf16, #tpu.memory_space<vmem>>, %arg6: memref<1x256xf32, #tpu.memory_space<vmem>>, %arg7: memref<16x256xbf16, #tpu.memory_space<vmem>>, %arg8: memref<16x128xbf16, #tpu.memory_space<vmem>>) attributes {dimension_semantics = [#tpu.dimension_semantics<parallel>, #tpu.dimension_semantics<arbitrary>], iteration_bounds = array<i64: 1, 1>, scalar_prefetch = 0 : i64, scratch_operands = 1 : i64, tpu.core_type = #tpu.core_type<tc>, window_params = [{transform_indices = @transform_0, window_bounds = array<i64: 16, 256>}, {pipeline_mode = #tpu.pipeline_mode<synchronous>, transform_indices = @transform_1, window_bounds = array<i64: 256, 128>}, {pipeline_mode = #tpu.pipeline_mode<synchronous>, transform_indices = @transform_2, window_bounds = array<i64: 1, 128>}, {transform_indices = @transform_3, window_bounds = array<i64: 128, 256>}, {transform_indices = @transform_4, window_bounds = array<i64: 1, 256>}, {transform_indices = @transform_5, window_bounds = array<i64: 16, 256>}]} {
    %c0_i32 = arith.constant 0 : i32
    %0 = arith.cmpi eq, %arg1, %c0_i32 : i32
    %1 = arith.extui %0 : i1 to i32
    %c0_i32_0 = arith.constant 0 : i32
    %2 = arith.cmpi ne, %1, %c0_i32_0 : i32
    scf.if %2 {
      %c0_9 = arith.constant 0 : index
      %c0_10 = arith.constant 0 : index
      %16 = vector.load %arg2[%c0_9, %c0_10] : memref<16x256xbf16, #tpu.memory_space<vmem>>, vector<16x256xbf16>
      %c0_11 = arith.constant 0 : index
      %c0_12 = arith.constant 0 : index
      %17 = vector.load %arg3[%c0_11, %c0_12] : memref<256x128xbf16, #tpu.memory_space<vmem>>, vector<256x128xbf16>
      %cst_13 = arith.constant dense<0.000000e+00> : vector<16x128xf32>
      %18 = tpu.matmul %16, %17, %cst_13 {dimension_numbers = #tpu.dot_dimension_numbers<[1], [0], [0], [1], [0, 0, 1, 1], [], []>} : vector<16x256xbf16>, vector<256x128xbf16>, vector<16x128xf32> -> vector<16x128xf32>
      %c0_14 = arith.constant 0 : index
      %c0_15 = arith.constant 0 : index
      %19 = vector.load %arg4[%c0_14, %c0_15] : memref<1x128xf32, #tpu.memory_space<vmem>>, vector<1x128xf32>
      %20 = vector.broadcast %19 : vector<1x128xf32> to vector<16x128xf32>
      %21 = arith.addf %18, %20 : vector<16x128xf32>
      %cst_16 = arith.constant 0.000000e+00 : f32
      %22 = vector.broadcast %cst_16 : f32 to vector<16x128xf32>
      %23 = arith.maximumf %21, %22 : vector<16x128xf32>
      %24 = arith.truncf %23 : vector<16x128xf32> to vector<16x128xbf16>
      %c0_17 = arith.constant 0 : index
      %c0_18 = arith.constant 0 : index
      %25 = vector.load %arg8[%c0_17, %c0_18] : memref<16x128xbf16, #tpu.memory_space<vmem>>, vector<16x128xbf16>
      tpu.vector_store %arg8[%c0_17, %c0_18], %24 {strides = array<i32>} : memref<16x128xbf16, #tpu.memory_space<vmem>>, vector<16x128xbf16>,
    } else {
    }
    %c0 = arith.constant 0 : index
    %c0_1 = arith.constant 0 : index
    %3 = vector.load %arg8[%c0, %c0_1] : memref<16x128xbf16, #tpu.memory_space<vmem>>, vector<16x128xbf16>
    %c0_2 = arith.constant 0 : index
    %c0_3 = arith.constant 0 : index
    %4 = vector.load %arg5[%c0_2, %c0_3] : memref<128x256xbf16, #tpu.memory_space<vmem>>, vector<128x256xbf16>
    %cst = arith.constant dense<0.000000e+00> : vector<16x256xf32>
    %5 = tpu.matmul %3, %4, %cst {dimension_numbers = #tpu.dot_dimension_numbers<[1], [0], [0], [1], [0, 0, 1, 1], [], []>} : vector<16x128xbf16>, vector<128x256xbf16>, vector<16x256xf32> -> vector<16x256xf32>
    %c0_4 = arith.constant 0 : index
    %c0_5 = arith.constant 0 : index
    %6 = vector.load %arg6[%c0_4, %c0_5] : memref<1x256xf32, #tpu.memory_space<vmem>>, vector<1x256xf32>
    %7 = vector.broadcast %6 : vector<1x256xf32> to vector<16x256xf32>
    %8 = arith.addf %5, %7 : vector<16x256xf32>
    %9 = arith.negf %8 : vector<16x256xf32>
    %10 = math.exp %9 : vector<16x256xf32>
    %cst_6 = arith.constant 1.000000e+00 : f32
    %11 = vector.broadcast %cst_6 : f32 to vector<16x256xf32>
    %12 = arith.addf %11, %10 : vector<16x256xf32>
    %13 = arith.divf %11, %12 : vector<16x256xf32>
    %14 = arith.truncf %13 : vector<16x256xf32> to vector<16x256xbf16>
    %c0_7 = arith.constant 0 : index
    %c0_8 = arith.constant 0 : index
    %15 = vector.load %arg7[%c0_7, %c0_8] : memref<16x256xbf16, #tpu.memory_space<vmem>>, vector<16x256xbf16>
    tpu.vector_store %arg7[%c0_7, %c0_8], %14 {strides = array<i32>} : memref<16x256xbf16, #tpu.memory_space<vmem>>, vector<16x256xbf16>,
    return
  }
  func.func @transform_0(%arg0: i32, %arg1: i32) -> (i32, i32) {
    %c0_i32 = arith.constant 0 : i32
    %c0_i32_0 = arith.constant 0 : i32
    return %arg0, %c0_i32 : i32, i32
  }
  func.func @transform_1(%arg0: i32, %arg1: i32) -> (i32, i32) {
    %c0_i32 = arith.constant 0 : i32
    %c0_i32_0 = arith.constant 0 : i32
    %c0_i32_1 = arith.constant 0 : i32
    return %c0_i32, %c0_i32_0 : i32, i32
  }
  func.func @transform_2(%arg0: i32, %arg1: i32) -> (i32, i32) {
    %c0_i32 = arith.constant 0 : i32
    %c0_i32_0 = arith.constant 0 : i32
    %c0_i32_1 = arith.constant 0 : i32
    return %c0_i32, %c0_i32_0 : i32, i32
  }
  func.func @transform_3(%arg0: i32, %arg1: i32) -> (i32, i32) {
    %c0_i32 = arith.constant 0 : i32
    %c0_i32_0 = arith.constant 0 : i32
    return %c0_i32, %arg1 : i32, i32
  }
  func.func @transform_4(%arg0: i32, %arg1: i32) -> (i32, i32) {
    %c0_i32 = arith.constant 0 : i32
    %c0_i32_0 = arith.constant 0 : i32
    return %c0_i32, %arg1 : i32, i32
  }
  func.func @transform_5(%arg0: i32, %arg1: i32) -> (i32, i32) {
    %c0_i32 = arith.constant 0 : i32
    return %arg0, %arg1 : i32, i32
  }
}

</mosaic_0001>

<bundles_post_ra>
// kernel: _forward_impl.1
= control target key start
LH: loop header
LB: loop body
LE: loop exit
PB: predicated region body
PF: predicated region fallthrough
CT: control target
= control target key end

     0   :  { %10 = vsyncpa [#allocation4], 0  ;;  %s699_s0 = inlined_call_operand.vmem [shape: bf16[16,256], index: 0, kind: input, shape index: {}]   ;;  %s700_s1 = inlined_call_operand.hbm [shape: bf16[256,128], index: 1, kind: input, shape index: {}]   ;;  %s701_s2 = inlined_call_operand.vmem [shape: f32[1,128], index: 2, kind: input, shape index: {}]   ;;  %s702_s3 = inlined_call_operand.hbm [shape: bf16[128,256], index: 3, kind: input, shape index: {}]   ;;  %s703_s4 = inlined_call_operand.vmem [shape: f32[1,256], index: 4, kind: input, shape index: {}]   ;;  %s704_s5 = inlined_call_operand.vmem [shape: bf16[16,256], index: 5, kind: output, shape index: {}]  }
   0x1   :  { %11 = vsyncpa [#allocation6], 0  ;;  %s620_s18 = smov [#allocation3]   ;;  %s572_s22 = scalar_lea.hbm %s700_s1, 2048 }
   0x2   :  { %s19_s19 = sshll.u32 %s620_s18, 4  ;;  %p573_p0 = scmp.ne.s32.totalorder %s700_s1, %s572_s22  ;;  %s20_s19 = int_to_ptr.vmem [resolvable:$true] %s19_s19 }
   0x3   :  { %p576_p1 = scmp.lt.u32.totalorder %s572_s22, %s700_s1 }
   0x5   :  { %p578_p2 = pnand %p576_p1, %p573_p0 }
   0x7   :  { %581 = shalt.err (!%p578_p2)
}
   0x8   :  { %s582_s27 = scalar_lea.vmem %s20_s19, 2048  ;;  %p587_p4 = scmp.lt.s32.totalorder %s20_s19, %s20_s19 }
   0x9   :  { %p583_p3 = scmp.ne.s32.totalorder %s20_s19, %s582_s27  ;;  %p588_p5 = scmp.lt.s32.totalorder %s582_s27, %s582_s27 }
   0xb   :  { %p589_p6 = por %p588_p5, %p587_p4 }
   0xd   :  { %p590_p7 = pnand %p589_p6, %p583_p3 }
   0xf   :  { %593 = shalt.err (!%p590_p7)
}
  0x10   :  { %s621_s28 = smov 64   ;;  %s622_s29 = smov 4  }
  0x11   :  { %25 = dma.hbm_to_vmem [thread:$0]  %s700_s1, 2048, %s20_s19, [#allocation4], %s621_s28, %s621_s28, %s622_s29  }
  0x12   :  { %s623_s7 = smov [#allocation5]   ;;  %s594_s11 = scalar_lea.hbm %s702_s3, 2048 }
  0x13   :  { %s33_s8 = sshll.u32 %s623_s7, 4  ;;  %p595_p8 = scmp.ne.s32.totalorder %s702_s3, %s594_s11  ;;  %s34_s8 = int_to_ptr.vmem [resolvable:$true] %s33_s8 }
  0x14   :  { %p598_p9 = scmp.lt.u32.totalorder %s594_s11, %s702_s3 }
  0x16   :  { %p600_p10 = pnand %p598_p9, %p595_p8 }
  0x18   :  { %603 = shalt.err (!%p600_p10)
}
  0x19   :  { %s604_s16 = scalar_lea.vmem %s34_s8, 2048  ;;  %p609_p12 = scmp.lt.s32.totalorder %s34_s8, %s34_s8 }
  0x1a   :  { %p605_p11 = scmp.ne.s32.totalorder %s34_s8, %s604_s16  ;;  %p610_p13 = scmp.lt.s32.totalorder %s604_s16, %s604_s16 }
  0x1c   :  { %p611_p0 = por %p610_p13, %p609_p12 }
  0x1e   :  { %p612_p1 = pnand %p611_p0, %p605_p11 }
  0x20   :  { %615 = shalt.err (!%p612_p1)
}
  0x21   :  { %s624_s1 = smov 128   ;;  %s625_s17 = smov 8  }
  0x22   :  { %39 = dma.hbm_to_vmem [thread:$0]  %s702_s3, 2048, %s34_s8, [#allocation6], %s624_s1, %s624_s1, %s625_s17  }
  0x23   :  { %616 = dma.done.wait [#allocation4], 2048  }
  0x24   :  { %617 = vsyncadd [#allocation4], 4294965248 }
  0x25   :  { %618 = dma.done.wait [#allocation6], 2048  }
  0x26   :  { %619 = vsyncadd [#allocation6], 4294965248  ;;  %v513_v0 = vld [vmem:[#allocation3 + $0x40] sm:$0xff]   ;;  %v515_v2 = vld [vmem:[#allocation3 + $0x48] sm:$0xff]   ;;  %v626_v34 = vmov 0   ;;  %v264_v47 = vlaneseq }
  0x27   :  { %v514_v1 = vld [vmem:[#allocation3] sm:$0xff]   ;;  %484 = vmatprep.subr.bf16.mxu0 %v513_v0  ;;  %v516_v3 = vld [vmem:[#allocation3 + $0x8] sm:$0xff]   ;;  %v517_v4 = vld [vmem:[#allocation3 + $0x50] sm:$0xff]   ;;  %386 = vmatprep.mubr.bf16.mxu1 %v626_v34 }
  0x28   :  { %485 = vmatpush3.bf16.msra.mxu0 %v514_v1  ;;  %v518_v5 = vld [vmem:[#allocation3 + $0x10] sm:$0xff]   ;;  %v519_v6 = vld [vmem:[#allocation3 + $0x58] sm:$0xff]   ;;  %v521_v8 = vld [vmem:[#allocation3 + $0x60] sm:$0xff]   ;;  %v265_v48 = vshrl.u32 %v264_v47, 7 }
  0x29   :  { %486 = vmatprep.subr.bf16.mxu0 %v515_v2  ;;  %v520_v7 = vld [vmem:[#allocation3 + $0x18] sm:$0xff]   ;;  %v522_v9 = vld [vmem:[#allocation3 + $0x20] sm:$0xff]   ;;  %v523_v10 = vld [vmem:[#allocation3 + $0x68] sm:$0xff]  }
  0x2a   :  { %v531_v11 = vld [vmem:[%s699_s0 + $0x4] ss:$8 sps:$4 sm:$0xff]   ;;  %v534_v13 = vld [vmem:[#allocation5] ss:$8 sps:$4 sm:$0xff]   ;;  %v535_v15 = vld [vmem:[#allocation5 + $0x14] ss:$8 sps:$4 sm:$0xff]  }
  0x2b   :  { %v532_v12 = vld [vmem:[#allocation5 + $0x4] ss:$8 sps:$4 sm:$0xff]   ;;  %232 = vmatprep.mubr.bf16.mxu0 %v531_v11  ;;  %v525_v16 = vld [vmem:[#allocation3 + $0x70] sm:$0xff]   ;;  %v527_v20 = vld [vmem:[#allocation3 + $0x78] sm:$0xff]   ;;  %v266_v49 = vsub.s32 0, %v265_v48  ;;  %v270_v51 = vsub.s32 1, %v265_v48 }
  0x2c   :  { %487 = vmatpush3.bf16.msra.mxu0 %v516_v3  ;;  %v524_v14 = vld [vmem:[#allocation3 + $0x28] sm:$0xff]   ;;  %354 = vmatprep.subr.bf16.mxu1 %v532_v12  ;;  %v537_v17 = vld [vmem:[#allocation5 + $0x10] ss:$8 sps:$4 sm:$0xff]   ;;  %v541_v22 = vld [vmem:[#allocation5 + $0x34] ss:$8 sps:$4 sm:$0xff]  }
  0x2d   :  { %488 = vmatprep.subr.bf16.mxu0 %v517_v4  ;;  %355 = vmatpush1.bf16.msra.mxu1 %v534_v13  ;;  %v526_v18 = vld [vmem:[#allocation3 + $0x30] sm:$0xff]   ;;  %v538_v19 = vld [vmem:[#allocation5 + $0x24] ss:$8 sps:$4 sm:$0xff]   ;;  %v540_v21 = vld [vmem:[#allocation5 + $0x20] ss:$8 sps:$4 sm:$0xff]  }
  0x2e   :  { %356 = vmatprep.subr.bf16.mxu1 %v535_v15  ;;  %v528_v23 = vld [vmem:[#allocation3 + $0x38] sm:$0xff]   ;;  %v529_v25 = vld [vmem:[%s699_s0] ss:$8 sps:$4 sm:$0xff]   ;;  %v544_v26 = vld [vmem:[#allocation5 + $0x44] ss:$8 sps:$4 sm:$0xff]  }
  0x2f   :  { %v543_v24 = vld [vmem:[#allocation5 + $0x30] ss:$8 sps:$4 sm:$0xff]   ;;  %v546_v27 = vld [vmem:[#allocation5 + $0x40] ss:$8 sps:$4 sm:$0xff]   ;;  %v547_v28 = vld [vmem:[#allocation5 + $0x54] ss:$8 sps:$4 sm:$0xff]  }
  0x30   :  { %489 = vmatpush3.bf16.msra.mxu0 %v518_v5  ;;  %v549_v29 = vld [vmem:[#allocation5 + $0x50] ss:$8 sps:$4 sm:$0xff]   ;;  %v550_v30 = vld [vmem:[#allocation5 + $0x64] ss:$8 sps:$4 sm:$0xff]   ;;  %v552_v31 = vld [vmem:[#allocation5 + $0x60] ss:$8 sps:$4 sm:$0xff]  }
  0x31   :  { %490 = vmatprep.subr.bf16.mxu0 %v519_v6  ;;  %357 = vmatpush1.bf16.msra.mxu1 %v537_v17  ;;  %v553_v32 = vld [vmem:[#allocation5 + $0x74] ss:$8 sps:$4 sm:$0xff]   ;;  %v555_v33 = vld [vmem:[#allocation5 + $0x70] ss:$8 sps:$4 sm:$0xff]   ;;  %v441_v36 = vld [vmem:[%s701_s2] ss:$0 sm:$0xff] }
  0x32   :  { %358 = vmatprep.subr.bf16.mxu1 %v538_v19  ;;  %v262_v50 = vld [vmem:[%s703_s4] sm:$0x3] }
  0x33   :  { %v267_v52 = vrot.slane %v262_v50, %v266_v49  ;;  %v271_v53 = vrot.slane %v262_v50, %v270_v51 }
  0x34   :  { %491 = vmatpush3.bf16.msra.mxu0 %v520_v7 }
  0x35   :  { %492 = vmatprep.subr.bf16.mxu0 %v521_v8  ;;  %359 = vmatpush1.bf16.msra.mxu1 %v540_v21 }
  0x36   :  { %360 = vmatprep.subr.bf16.mxu1 %v541_v22 }
  0x38   :  { %493 = vmatpush3.bf16.msra.mxu0 %v522_v9 }
  0x39   :  { %494 = vmatprep.subr.bf16.mxu0 %v523_v10  ;;  %361 = vmatpush1.bf16.msra.mxu1 %v543_v24 }
  0x3a   :  { %362 = vmatprep.subr.bf16.mxu1 %v544_v26 }
  0x3c   :  { %495 = vmatpush3.bf16.msra.mxu0 %v524_v14 }
  0x3d   :  { %496 = vmatprep.subr.bf16.mxu0 %v525_v16  ;;  %363 = vmatpush1.bf16.msra.mxu1 %v546_v27 }
  0x3e   :  { %364 = vmatprep.subr.bf16.mxu1 %v547_v28 }
  0x40   :  { %497 = vmatpush3.bf16.msra.mxu0 %v526_v18 }
  0x41   :  { %498 = vmatprep.subr.bf16.mxu0 %v527_v20  ;;  %365 = vmatpush1.bf16.msra.mxu1 %v549_v29 }
  0x42   :  { %366 = vmatprep.subr.bf16.mxu1 %v550_v30 }
  0x44   :  { %499 = vmatpush3.bf16.msra.mxu0 %v528_v23 }
  0x45   :  { %367 = vmatpush1.bf16.msra.mxu1 %v552_v31 }
  0x46   :  { %368 = vmatprep.subr.bf16.mxu1 %v553_v32 }
  0x47   :  { %233 = vmatmul.mubr.bf16.vlgmr.msra.gmra.mrb[0].mxu0 %v529_v25 }
  0x49   :  { %369 = vmatpush1.bf16.msra.mxu1 %v555_v33 }
 0x11a   :  { %v500_v35 = vpop.f32.mrb[0].mxu0 }
 0x11b   :  { %v501_v37 = vpop.f32.mrb[1].mxu0 }
 0x11c   :  { %v502_v38 = vadd.f32 %v501_v37, %v500_v35  ;;  %v503_v39 = vpop.f32.mrb[2].mxu0 }
 0x11d   :  { %v504_v40 = vpop.f32.mrb[3].mxu0 }
 0x11e   :  { %v235_v41 = vadd.f32 %v502_v38, %v441_v36  ;;  %v505_v42 = vadd.f32 %v504_v40, %v503_v39 }
 0x120   :  { %v238_v43 = vadd.f32 %v505_v42, %v441_v36  ;;  %v241_v44 = vmax.f32 %v235_v41, 0.0 }
 0x122   :  { %v242_v45 = vmax.f32 %v238_v43, 0.0 }
 0x124   :  { %v243_v46 = vpack.c.bf16 %v242_v45, %v241_v44 }
 0x126   :  { %387 = vmatmul.mubr.bf16.vlgmr.msra.gmra.mrb[0].mxu1 %v243_v46 }
 0x1f9   :  { %v388_v54 = vpop.f32.mrb[0].mxu1 }
 0x1fa   :  { %v389_v55 = vadd.f32 %v388_v54, %v267_v52  ;;  %v390_v56 = vpop.f32.mrb[1].mxu1 }
 0x1fb   :  { %v391_v57 = vadd.f32 %v390_v56, %v271_v53  ;;  %v392_v58 = vpop.f32.mrb[2].mxu1 }
 0x1fc   :  { %v476_v59 = vmul.f32 -1.442695, %v389_v55  ;;  %v393_v60 = vadd.f32 %v392_v58, %v267_v52  ;;  %v394_v61 = vpop.f32.mrb[3].mxu1 }
 0x1fd   :  { %v477_v62 = vmul.f32 -1.442695, %v391_v57  ;;  %v395_v63 = vadd.f32 %v394_v61, %v271_v53 }
 0x1fe   :  { %556 = vpow2.f32 %v476_v59  ;;  %v478_v0 = vmul.f32 -1.442695, %v393_v60 }
 0x1ff   :  { %558 = vpow2.f32 %v477_v62  ;;  %v479_v1 = vmul.f32 -1.442695, %v395_v63 }
 0x200   :  { %560 = vpow2.f32 %v478_v0 }
 0x201   :  { %562 = vpow2.f32 %v479_v1 }
 0x208   :  { %v557_v2 = vpop.eup %556 }
 0x209   :  { %v559_v3 = vpop.eup %558  ;;  %v409_v4 = vadd.f32 1.0, %v557_v2 }
 0x20a   :  { %v561_v5 = vpop.eup %560  ;;  %v410_v6 = vadd.f32 1.0, %v559_v3 }
 0x20b   :  { %v563_v7 = vpop.eup %562  ;;  %564 = vrcp.f32 %v409_v4  ;;  %v411_v8 = vadd.f32 1.0, %v561_v5 }
 0x20c   :  { %566 = vrcp.f32 %v410_v6  ;;  %v412_v9 = vadd.f32 1.0, %v563_v7 }
 0x20d   :  { %568 = vrcp.f32 %v411_v8 }
 0x20e   :  { %570 = vrcp.f32 %v412_v9 }
 0x215   :  { %v565_v10 = vpop.eup %564 }
 0x216   :  { %v567_v11 = vpop.eup %566 }
 0x217   :  { %v569_v12 = vpop.eup %568  ;;  %v482_v13 = vpack.c.bf16 %v567_v11, %v565_v10 }
 0x218   :  { %v571_v14 = vpop.eup %570 }
 0x219   :  { %433 = vst [vmem:[%s704_s5] sm:$0xff] %v482_v13  ;;  %v483_v15 = vpack.c.bf16 %v571_v14, %v569_v12 }
 0x21b   :  { %434 = vst [vmem:[%s704_s5 + $0x8] sm:$0xff] %v483_v15 }
 0x21c   :  { %439 = vsyncpa [#allocation4], 1 }
 0x21d   :  { %440 = vsyncpa [#allocation6], 1 }

// kernel: _forward_impl.1
= control target key start
LH: loop header
LB: loop body
LE: loop exit
PB: predicated region body
PF: predicated region fallthrough
CT: control target
= control target key end

     0   :  { %10 = vsyncpa [#allocation4], 0  ;;  %s699_s0 = inlined_call_operand.vmem [shape: bf16[16,256], index: 0, kind: input, shape index: {}]   ;;  %s700_s1 = inlined_call_operand.hbm [shape: bf16[256,128], index: 1, kind: input, shape index: {}]   ;;  %s701_s2 = inlined_call_operand.vmem [shape: f32[1,128], index: 2, kind: input, shape index: {}]   ;;  %s702_s3 = inlined_call_operand.hbm [shape: bf16[128,256], index: 3, kind: input, shape index: {}]   ;;  %s703_s4 = inlined_call_operand.vmem [shape: f32[1,256], index: 4, kind: input, shape index: {}]   ;;  %s704_s5 = inlined_call_operand.vmem [shape: bf16[16,256], index: 5, kind: output, shape index: {}]  }
   0x1   :  { %11 = vsyncpa [#allocation6], 0  ;;  %s620_s18 = smov [#allocation3]   ;;  %s572_s22 = scalar_lea.hbm %s700_s1, 2048 }
   0x2   :  { %s19_s19 = sshll.u32 %s620_s18, 4  ;;  %p573_p0 = scmp.ne.s32.totalorder %s700_s1, %s572_s22  ;;  %s20_s19 = int_to_ptr.vmem [resolvable:$true] %s19_s19 }
   0x3   :  { %p576_p1 = scmp.lt.u32.totalorder %s572_s22, %s700_s1 }
   0x5   :  { %p578_p2 = pnand %p576_p1, %p573_p0 }
   0x7   :  { %581 = shalt.err (!%p578_p2)
}
   0x8   :  { %s582_s27 = scalar_lea.vmem %s20_s19, 2048  ;;  %p587_p4 = scmp.lt.s32.totalorder %s20_s19, %s20_s19 }
   0x9   :  { %p583_p3 = scmp.ne.s32.totalorder %s20_s19, %s582_s27  ;;  %p588_p5 = scmp.lt.s32.totalorder %s582_s27, %s582_s27 }
   0xb   :  { %p589_p6 = por %p588_p5, %p587_p4 }
   0xd   :  { %p590_p7 = pnand %p589_p6, %p583_p3 }
   0xf   :  { %593 = shalt.err (!%p590_p7)
}
  0x10   :  { %s621_s28 = smov 64   ;;  %s622_s29 = smov 4  }
  0x11   :  { %25 = dma.hbm_to_vmem [thread:$0]  %s700_s1, 2048, %s20_s19, [#allocation4], %s621_s28, %s621_s28, %s622_s29  }
  0x12   :  { %s623_s7 = smov [#allocation5]   ;;  %s594_s11 = scalar_lea.hbm %s702_s3, 2048 }
  0x13   :  { %s33_s8 = sshll.u32 %s623_s7, 4  ;;  %p595_p8 = scmp.ne.s32.totalorder %s702_s3, %s594_s11  ;;  %s34_s8 = int_to_ptr.vmem [resolvable:$true] %s33_s8 }
  0x14   :  { %p598_p9 = scmp.lt.u32.totalorder %s594_s11, %s702_s3 }
  0x16   :  { %p600_p10 = pnand %p598_p9, %p595_p8 }
  0x18   :  { %603 = shalt.err (!%p600_p10)
}
  0x19   :  { %s604_s16 = scalar_lea.vmem %s34_s8, 2048  ;;  %p609_p12 = scmp.lt.s32.totalorder %s34_s8, %s34_s8 }
  0x1a   :  { %p605_p11 = scmp.ne.s32.totalorder %s34_s8, %s604_s16  ;;  %p610_p13 = scmp.lt.s32.totalorder %s604_s16, %s604_s16 }
  0x1c   :  { %p611_p0 = por %p610_p13, %p609_p12 }
  0x1e   :  { %p612_p1 = pnand %p611_p0, %p605_p11 }
  0x20   :  { %615 = shalt.err (!%p612_p1)
}
  0x21   :  { %s624_s1 = smov 128   ;;  %s625_s17 = smov 8  }
  0x22   :  { %39 = dma.hbm_to_vmem [thread:$0]  %s702_s3, 2048, %s34_s8, [#allocation6], %s624_s1, %s624_s1, %s625_s17  }
  0x23   :  { %616 = dma.done.wait [#allocation4], 2048  }
  0x24   :  { %617 = vsyncadd [#allocation4], 4294965248 }
  0x25   :  { %618 = dma.done.wait [#allocation6], 2048  }
  0x26   :  { %619 = vsyncadd [#allocation6], 4294965248  ;;  %v513_v0 = vld [vmem:[#allocation3 + $0x40] sm:$0xff]   ;;  %v515_v2 = vld [vmem:[#allocation3 + $0x48] sm:$0xff]   ;;  %v626_v34 = vmov 0   ;;  %v264_v47 = vlaneseq }
  0x27   :  { %v514_v1 = vld [vmem:[#allocation3] sm:$0xff]   ;;  %484 = vmatprep.subr.bf16.mxu0 %v513_v0  ;;  %v516_v3 = vld [vmem:[#allocation3 + $0x8] sm:$0xff]   ;;  %v517_v4 = vld [vmem:[#allocation3 + $0x50] sm:$0xff]   ;;  %386 = vmatprep.mubr.bf16.mxu1 %v626_v34 }
  0x28   :  { %485 = vmatpush3.bf16.msra.mxu0 %v514_v1  ;;  %v518_v5 = vld [vmem:[#allocation3 + $0x10] sm:$0xff]   ;;  %v519_v6 = vld [vmem:[#allocation3 + $0x58] sm:$0xff]   ;;  %v521_v8 = vld [vmem:[#allocation3 + $0x60] sm:$0xff]   ;;  %v265_v48 = vshrl.u32 %v264_v47, 7 }
  0x29   :  { %486 = vmatprep.subr.bf16.mxu0 %v515_v2  ;;  %v520_v7 = vld [vmem:[#allocation3 + $0x18] sm:$0xff]   ;;  %v522_v9 = vld [vmem:[#allocation3 + $0x20] sm:$0xff]   ;;  %v523_v10 = vld [vmem:[#allocation3 + $0x68] sm:$0xff]  }
  0x2a   :  { %v531_v11 = vld [vmem:[%s699_s0 + $0x4] ss:$8 sps:$4 sm:$0xff]   ;;  %v534_v13 = vld [vmem:[#allocation5] ss:$8 sps:$4 sm:$0xff]   ;;  %v535_v15 = vld [vmem:[#allocation5 + $0x14] ss:$8 sps:$4 sm:$0xff]  }
  0x2b   :  { %v532_v12 = vld [vmem:[#allocation5 + $0x4] ss:$8 sps:$4 sm:$0xff]   ;;  %232 = vmatprep.mubr.bf16.mxu0 %v531_v11  ;;  %v525_v16 = vld [vmem:[#allocation3 + $0x70] sm:$0xff]   ;;  %v527_v20 = vld [vmem:[#allocation3 + $0x78] sm:$0xff]   ;;  %v266_v49 = vsub.s32 0, %v265_v48  ;;  %v270_v51 = vsub.s32 1, %v265_v48 }
  0x2c   :  { %487 = vmatpush3.bf16.msra.mxu0 %v516_v3  ;;  %v524_v14 = vld [vmem:[#allocation3 + $0x28] sm:$0xff]   ;;  %354 = vmatprep.subr.bf16.mxu1 %v532_v12  ;;  %v537_v17 = vld [vmem:[#allocation5 + $0x10] ss:$8 sps:$4 sm:$0xff]   ;;  %v541_v22 = vld [vmem:[#allocation5 + $0x34] ss:$8 sps:$4 sm:$0xff]  }
  0x2d   :  { %488 = vmatprep.subr.bf16.mxu0 %v517_v4  ;;  %355 = vmatpush1.bf16.msra.mxu1 %v534_v13  ;;  %v526_v18 = vld [vmem:[#allocation3 + $0x30] sm:$0xff]   ;;  %v538_v19 = vld [vmem:[#allocation5 + $0x24] ss:$8 sps:$4 sm:$0xff]   ;;  %v540_v21 = vld [vmem:[#allocation5 + $0x20] ss:$8 sps:$4 sm:$0xff]  }
  0x2e   :  { %356 = vmatprep.subr.bf16.mxu1 %v535_v15  ;;  %v528_v23 = vld [vmem:[#allocation3 + $0x38] sm:$0xff]   ;;  %v529_v25 = vld [vmem:[%s699_s0] ss:$8 sps:$4 sm:$0xff]   ;;  %v544_v26 = vld [vmem:[#allocation5 + $0x44] ss:$8 sps:$4 sm:$0xff]  }
  0x2f   :  { %v543_v24 = vld [vmem:[#allocation5 + $0x30] ss:$8 sps:$4 sm:$0xff]   ;;  %v546_v27 = vld [vmem:[#allocation5 + $0x40] ss:$8 sps:$4 sm:$0xff]   ;;  %v547_v28 = vld [vmem:[#allocation5 + $0x54] ss:$8 sps:$4 sm:$0xff]  }
  0x30   :  { %489 = vmatpush3.bf16.msra.mxu0 %v518_v5  ;;  %v549_v29 = vld [vmem:[#allocation5 + $0x50] ss:$8 sps:$4 sm:$0xff]   ;;  %v550_v30 = vld [vmem:[#allocation5 + $0x64] ss:$8 sps:$4 sm:$0xff]   ;;  %v552_v31 = vld [vmem:[#allocation5 + $0x60] ss:$8 sps:$4 sm:$0xff]  }
  0x31   :  { %490 = vmatprep.subr.bf16.mxu0 %v519_v6  ;;  %357 = vmatpush1.bf16.msra.mxu1 %v537_v17  ;;  %v553_v32 = vld [vmem:[#allocation5 + $0x74] ss:$8 sps:$4 sm:$0xff]   ;;  %v555_v33 = vld [vmem:[#allocation5 + $0x70] ss:$8 sps:$4 sm:$0xff]   ;;  %v441_v36 = vld [vmem:[%s701_s2] ss:$0 sm:$0xff] }
  0x32   :  { %358 = vmatprep.subr.bf16.mxu1 %v538_v19  ;;  %v262_v50 = vld [vmem:[%s703_s4] sm:$0x3] }
  0x33   :  { %v267_v52 = vrot.slane %v262_v50, %v266_v49  ;;  %v271_v53 = vrot.slane %v262_v50, %v270_v51 }
  0x34   :  { %491 = vmatpush3.bf16.msra.mxu0 %v520_v7 }
  0x35   :  { %492 = vmatprep.subr.bf16.mxu0 %v521_v8  ;;  %359 = vmatpush1.bf16.msra.mxu1 %v540_v21 }
  0x36   :  { %360 = vmatprep.subr.bf16.mxu1 %v541_v22 }
  0x38   :  { %493 = vmatpush3.bf16.msra.mxu0 %v522_v9 }
  0x39   :  { %494 = vmatprep.subr.bf16.mxu0 %v523_v10  ;;  %361 = vmatpush1.bf16.msra.mxu1 %v543_v24 }
  0x3a   :  { %362 = vmatprep.subr.bf16.mxu1 %v544_v26 }
  0x3c   :  { %495 = vmatpush3.bf16.msra.mxu0 %v524_v14 }
  0x3d   :  { %496 = vmatprep.subr.bf16.mxu0 %v525_v16  ;;  %363 = vmatpush1.bf16.msra.mxu1 %v546_v27 }
  0x3e   :  { %364 = vmatprep.subr.bf16.mxu1 %v547_v28 }
  0x40   :  { %497 = vmatpush3.bf16.msra.mxu0 %v526_v18 }
  0x41   :  { %498 = vmatprep.subr.bf16.mxu0 %v527_v20  ;;  %365 = vmatpush1.bf16.msra.mxu1 %v549_v29 }
  0x42   :  { %366 = vmatprep.subr.bf16.mxu1 %v550_v30 }
  0x44   :  { %499 = vmatpush3.bf16.msra.mxu0 %v528_v23 }
  0x45   :  { %367 = vmatpush1.bf16.msra.mxu1 %v552_v31 }
  0x46   :  { %368 = vmatprep.subr.bf16.mxu1 %v553_v32 }
  0x47   :  { %233 = vmatmul.mubr.bf16.vlgmr.msra.gmra.mrb[0].mxu0 %v529_v25 }
  0x49   :  { %369 = vmatpush1.bf16.msra.mxu1 %v555_v33 }
 0x11a   :  { %v500_v35 = vpop.f32.mrb[0].mxu0 }
 0x11b   :  { %v501_v37 = vpop.f32.mrb[1].mxu0 }
 0x11c   :  { %v502_v38 = vadd.f32 %v501_v37, %v500_v35  ;;  %v503_v39 = vpop.f32.mrb[2].mxu0 }
 0x11d   :  { %v504_v40 = vpop.f32.mrb[3].mxu0 }
 0x11e   :  { %v235_v41 = vadd.f32 %v502_v38, %v441_v36  ;;  %v505_v42 = vadd.f32 %v504_v40, %v503_v39 }
 0x120   :  { %v238_v43 = vadd.f32 %v505_v42, %v441_v36  ;;  %v241_v44 = vmax.f32 %v235_v41, 0.0 }
 0x122   :  { %v242_v45 = vmax.f32 %v238_v43, 0.0 }
 0x124   :  { %v243_v46 = vpack.c.bf16 %v242_v45, %v241_v44 }
 0x126   :  { %387 = vmatmul.mubr.bf16.vlgmr.msra.gmra.mrb[0].mxu1 %v243_v46 }
 0x1f9   :  { %v388_v54 = vpop.f32.mrb[0].mxu1 }
 0x1fa   :  { %v389_v55 = vadd.f32 %v388_v54, %v267_v52  ;;  %v390_v56 = vpop.f32.mrb[1].mxu1 }
 0x1fb   :  { %v391_v57 = vadd.f32 %v390_v56, %v271_v53  ;;  %v392_v58 = vpop.f32.mrb[2].mxu1 }
 0x1fc   :  { %v476_v59 = vmul.f32 -1.442695, %v389_v55  ;;  %v393_v60 = vadd.f32 %v392_v58, %v267_v52  ;;  %v394_v61 = vpop.f32.mrb[3].mxu1 }
 0x1fd   :  { %v477_v62 = vmul.f32 -1.442695, %v391_v57  ;;  %v395_v63 = vadd.f32 %v394_v61, %v271_v53 }
 0x1fe   :  { %556 = vpow2.f32 %v476_v59  ;;  %v478_v0 = vmul.f32 -1.442695, %v393_v60 }
 0x1ff   :  { %558 = vpow2.f32 %v477_v62  ;;  %v479_v1 = vmul.f32 -1.442695, %v395_v63 }
 0x200   :  { %560 = vpow2.f32 %v478_v0 }
 0x201   :  { %562 = vpow2.f32 %v479_v1 }
 0x208   :  { %v557_v2 = vpop.eup %556 }
 0x209   :  { %v559_v3 = vpop.eup %558  ;;  %v409_v4 = vadd.f32 1.0, %v557_v2 }
 0x20a   :  { %v561_v5 = vpop.eup %560  ;;  %v410_v6 = vadd.f32 1.0, %v559_v3 }
 0x20b   :  { %v563_v7 = vpop.eup %562  ;;  %564 = vrcp.f32 %v409_v4  ;;  %v411_v8 = vadd.f32 1.0, %v561_v5 }
 0x20c   :  { %566 = vrcp.f32 %v410_v6  ;;  %v412_v9 = vadd.f32 1.0, %v563_v7 }
 0x20d   :  { %568 = vrcp.f32 %v411_v8 }
 0x20e   :  { %570 = vrcp.f32 %v412_v9 }
 0x215   :  { %v565_v10 = vpop.eup %564 }
 0x216   :  { %v567_v11 = vpop.eup %566 }
 0x217   :  { %v569_v12 = vpop.eup %568  ;;  %v482_v13 = vpack.c.bf16 %v567_v11, %v565_v10 }
 0x218   :  { %v571_v14 = vpop.eup %570 }
 0x219   :  { %433 = vst [vmem:[%s704_s5] sm:$0xff] %v482_v13  ;;  %v483_v15 = vpack.c.bf16 %v571_v14, %v569_v12 }
 0x21b   :  { %434 = vst [vmem:[%s704_s5 + $0x8] sm:$0xff] %v483_v15 }
 0x21c   :  { %439 = vsyncpa [#allocation4], 1 }
 0x21d   :  { %440 = vsyncpa [#allocation6], 1 }

</bundles_post_ra>
